<compile_context>
chip_gen: v6e
topology: v6e:2x2x1
jax: 0.10.0
libtpu: 0.0.40
codegen_flags: <defaults>
</compile_context>

<pallas_src>
import jax
import jax.numpy as jnp
from jax.experimental import pallas as pl
from jax.experimental.pallas import tpu as pltpu


def _leftpad_copy_kernel(x_ref, o_ref):
    # x_ref / o_ref: (TM, TL) tiles with identical block indices -> pure copy.
    o_ref[...] = x_ref[...]


def _sublane_pack(dtype) -> int:
    # Sub-32-bit dtypes pack along sublanes: f32 -> 8, bf16 -> 16, int8 -> 32.
    return max(8, 32 // jnp.dtype(dtype).itemsize)


def _compute_tiles(m: int, l_out: int, dtype, budget_bytes: int = 4 << 20):
    """Byte-budgeted tile sizes: full-row L tiles when possible, split L last."""
    itemsize = jnp.dtype(dtype).itemsize
    sub = _sublane_pack(dtype)
    l_pad = pl.cdiv(l_out, 128) * 128      # lane-dense, covers all of L_out
    m_pad = pl.cdiv(m, sub) * sub          # sublane-aligned row extent

    row_bytes = l_pad * itemsize
    if sub * row_bytes <= budget_bytes:
        # Full-row L tile; grow TM (sublane-aligned) to fill the byte budget.
        tl = l_pad
        tm = (budget_bytes // row_bytes) // sub * sub
        tm = max(sub, min(tm, m_pad))
    else:
        # A single sublane-pack of full rows already exceeds the budget:
        # shrink along L (multiples of 128), keep TM at the sublane pack.
        tl = (budget_bytes // (sub * itemsize)) // 128 * 128
        tl = max(128, min(tl, l_pad))
        tm = sub
    return tm, tl


def left_pad(x: jax.Array, padding: int) -> jax.Array:
    """Equivalent of LeftPad(padding)(x) for x of shape (N, C, L)."""
    assert padding > 0, "padding must be positive (slice x[..., :-padding])"
    n, c, l = x.shape
    l_out = l - padding
    assert l_out > 0, "padding must be smaller than the sequence length"

    # Flatten batch*channels into one dense row axis (free reshape).
    m = n * c
    x2d = x.reshape(m, l)

    itemsize = jnp.dtype(x.dtype).itemsize
    tm, tl = _compute_tiles(m, l_out, x.dtype)
    grid = (pl.cdiv(m, tm), pl.cdiv(l_out, tl))

    out2d = pl.pallas_call(
        _leftpad_copy_kernel,
        out_shape=jax.ShapeDtypeStruct((m, l_out), x.dtype),
        grid_spec=pltpu.PrefetchScalarGridSpec(
            num_scalar_prefetch=0,
            grid=grid,
            # Same block index for input and output: the input tile at
            # (mi, li) is exactly the output tile (we only drop trailing
            # columns).  The last L tile may read a few tail columns; the
            # corresponding output store lanes are masked by Pallas, so
            # results stay exact.
            in_specs=[pl.BlockSpec((tm, tl), lambda mi, li: (mi, li))],
            out_specs=pl.BlockSpec((tm, tl), lambda mi, li: (mi, li)),
        ),
        compiler_params=pltpu.CompilerParams(
            dimension_semantics=("parallel", "parallel"),
            # ~16 MiB of pipeline buffers (4 x 4 MiB) need more than v5e's
            # 16 MiB scoped default; 32 MiB is safe on v5e/v6e/v7x alike.
            vmem_limit_bytes=32 << 20,
        ),
        # Pure bandwidth: tells XLA's scheduler there is no compute to hide.
        cost_estimate=pl.CostEstimate(
            flops=0,
            transcendentals=0,
            bytes_accessed=2 * m * l_out * itemsize,
        ),
    )(x2d)

    return out2d.reshape(n, c, l_out)


if __name__ == "__main__":
    key = jax.random.PRNGKey(0)

    # Small TCN-like activation: batch=2, channels=4, seq=16, padding=3 -> 13.
    N, C, L, padding = 2, 4, 16, 3
    x = jax.random.normal(key, (N, C, L), dtype=jnp.float32)
    out = jax.block_until_ready(left_pad(x, padding))
    ref = x[:, :, :-padding]
    assert out.shape == (N, C, L - padding), out.shape
    assert out.dtype == x.dtype
    assert jnp.array_equal(out, ref), "fp32 mismatch vs reference slice"

    # Edge case: non-128-multiple L_out crossing a lane-tile boundary, bf16.
    x2 = jax.random.normal(jax.random.PRNGKey(0), (2, 6, 200), dtype=jnp.bfloat16)
    out2 = jax.block_until_ready(left_pad(x2, 7))
    ref2 = x2[:, :, :-7]
    assert out2.shape == ref2.shape and out2.dtype == x2.dtype
    assert jnp.array_equal(out2, ref2), "bf16 mismatch vs reference slice"

    # Edge case: longer sequence exercising the full-row / byte-budget path.
    x3 = jax.random.normal(jax.random.PRNGKey(0), (2, 8, 512), dtype=jnp.float32)
    out3 = jax.block_until_ready(left_pad(x3, 64))
    ref3 = x3[:, :, :-64]
    assert out3.shape == ref3.shape
    assert jnp.array_equal(out3, ref3), "fp32 long-seq mismatch vs reference slice"

    print("KERNEL_OK")
</pallas_src>

<mosaic_0001>
module attributes {stable_mosaic.version = 11 : i64} {
  func.func @_leftpad_copy_kernel(%arg0: i32, %arg1: i32, %arg2: memref<8x128xf32, #tpu.memory_space<vmem>>, %arg3: memref<8x128xf32, #tpu.memory_space<vmem>>) attributes {dimension_semantics = [#tpu.dimension_semantics<parallel>, #tpu.dimension_semantics<parallel>], iteration_bounds = array<i64: 1, 1>, scalar_prefetch = 0 : i64, scratch_operands = 0 : i64, tpu.core_type = #tpu.core_type<tc>, window_params = [{transform_indices = @transform_0, window_bounds = array<i64: 8, 128>}, {transform_indices = @transform_1, window_bounds = array<i64: 8, 128>}]} {
    %c0 = arith.constant 0 : index
    %c0_0 = arith.constant 0 : index
    %0 = vector.load %arg2[%c0, %c0_0] : memref<8x128xf32, #tpu.memory_space<vmem>>, vector<8x128xf32>
    %c0_1 = arith.constant 0 : index
    %c0_2 = arith.constant 0 : index
    %1 = vector.load %arg3[%c0_1, %c0_2] : memref<8x128xf32, #tpu.memory_space<vmem>>, vector<8x128xf32>
    tpu.vector_store %arg3[%c0_1, %c0_2], %0 {strides = array<i32>} : memref<8x128xf32, #tpu.memory_space<vmem>>, vector<8x128xf32>,
    return
  }
  func.func @transform_0(%arg0: i32, %arg1: i32) -> (i32, i32) {
    %c0_i32 = arith.constant 0 : i32
    return %arg0, %arg1 : i32, i32
  }
  func.func @transform_1(%arg0: i32, %arg1: i32) -> (i32, i32) {
    %c0_i32 = arith.constant 0 : i32
    return %arg0, %arg1 : i32, i32
  }
}

</mosaic_0001>

<bundles_post_ra>
// kernel: tpu_custom_call.1
= control target key start
LH: loop header
LB: loop body
LE: loop exit
PB: predicated region body
PF: predicated region fallthrough
CT: control target
= control target key end

     0   :  { %6 = vsyncpa [#allocation3], 0  ;;  %s102_s0 = inlined_call_operand.hbm [shape: f32[8,16], index: 0, kind: input, shape index: {}]   ;;  %s103_s1 = inlined_call_operand.hbm [shape: f32[8,13], index: 1, kind: output, shape index: {}]  }
   0x1   :  { %7 = vsyncpa [#allocation4], 0  ;;  %s84_s6 = smov [#allocation2]  }
   0x2   :  { %s14_s7 = sshll.u32 %s84_s6, 4  ;;  %s15_s7 = int_to_ptr.vmem [resolvable:$true] %s14_s7 }
   0x3   :  { %s48_s8 = scalar_lea.vmem %s15_s7, 128  ;;  %p53_p1 = scmp.lt.s32.totalorder %s15_s7, %s15_s7 }
   0x4   :  { %p49_p0 = scmp.ne.s32.totalorder %s15_s7, %s48_s8  ;;  %p54_p2 = scmp.lt.s32.totalorder %s48_s8, %s48_s8 }
   0x6   :  { %p55_p3 = por %p54_p2, %p53_p1 }
   0x8   :  { %p56_p4 = pnand %p55_p3, %p49_p0 }
   0xa   :  { %59 = shalt.err (!%p56_p4)
}
   0xb   :  { %17 = dma.hbm_to_vmem [thread:$0]  %s102_s0, 128, %s15_s7, [#allocation3]  }
   0xc   :  { %80 = dma.done.wait [#allocation3], 128  }
   0xd   :  { %81 = vsyncadd [#allocation3], 4294967168  ;;  %s85_s11 = smov [#allocation5]   ;;  %v21_v0 = vld [vmem:[#allocation2] sm:$0xff] }
   0xe   :  { %s29_s12 = sshll.u32 %s85_s11, 4  ;;  %22 = vst [vmem:[#allocation5] sm:$0xff] %v21_v0  ;;  %s30_s12 = int_to_ptr.vmem [resolvable:$true] %s29_s12 }
   0xf   :  { %s60_s13 = scalar_lea.vmem %s30_s12, 128  ;;  %p65_p6 = scmp.lt.s32.totalorder %s30_s12, %s30_s12 }
  0x10   :  { %p61_p5 = scmp.ne.s32.totalorder %s30_s12, %s60_s13  ;;  %p66_p7 = scmp.lt.s32.totalorder %s60_s13, %s60_s13 }
  0x12   :  { %p67_p8 = por %p66_p7, %p65_p6 }
  0x14   :  { %p68_p9 = pnand %p67_p8, %p61_p5 }
  0x16   :  { %71 = shalt.err (!%p68_p9)
}
  0x17   :  { %32 = dma.vmem_to_hbm [thread:$0]  %s30_s12, 128, %s103_s1, [#allocation4]  }
  0x18   :  { %82 = dma.done.wait [#allocation4], 128  }
  0x19   :  { %83 = vsyncadd [#allocation4], 4294967168 }
  0x1a   :  { %36 = vsyncpa [#allocation3], 1 }
  0x1b   :  { %37 = vsyncpa [#allocation4], 1 }

</bundles_post_ra>
